<compile_context>
chip_gen: v6e
topology: v6e:2x2x1
jax: 0.10.0
libtpu: 0.0.40
codegen_flags: <defaults>
</compile_context>

<pallas_src>
import functools
import math

import jax
import jax.numpy as jnp
from jax import lax
from jax.experimental import pallas as pl
from jax.experimental.pallas import tpu as pltpu


# ---------------------------------------------------------------------------
# Kernel 1: fused linear projection  y = x @ W + b  (full MXU width, bf16 out)
# ---------------------------------------------------------------------------
def _linear_kernel(x_ref, w_ref, b_ref, o_ref):
    acc = jnp.dot(x_ref[...], w_ref[...], preferred_element_type=jnp.float32)
    o_ref[...] = (acc + b_ref[...]).astype(o_ref.dtype)


def _linear(x2d, w, b, *, tm, vmem_limit_bytes):
    rows, d_in = x2d.shape
    d_out = w.shape[1]
    return pl.pallas_call(
        _linear_kernel,
        out_shape=jax.ShapeDtypeStruct((rows, d_out), jnp.bfloat16),
        grid_spec=pltpu.PrefetchScalarGridSpec(
            num_scalar_prefetch=0,
            grid=(rows // tm,),
            in_specs=[
                pl.BlockSpec((tm, d_in), lambda i: (i, 0)),
                pl.BlockSpec((d_in, d_out), lambda i: (0, 0)),
                pl.BlockSpec((1, d_out), lambda i: (0, 0)),
            ],
            out_specs=pl.BlockSpec((tm, d_out), lambda i: (i, 0)),
        ),
        compiler_params=pltpu.CompilerParams(
            dimension_semantics=("parallel",),
            vmem_limit_bytes=vmem_limit_bytes),
    )(x2d, w, b)


# ---------------------------------------------------------------------------
# Kernel 2: attention on projected Q/K/V + output projection + head-mean score
# ---------------------------------------------------------------------------
def _attention_kernel(q_ref, k_ref, v_ref, wo_ref, bo_ref, out_ref, score_ref,
                      *, head, d_head):
    q_all = q_ref[0]          # (tq, h_dim) bf16 (softmax scale already folded into W_q)
    k_all = k_ref[0]          # (Sk, h_dim) bf16
    v_all = v_ref[0]          # (Sk, h_dim) bf16

    inv_head = 1.0 / head
    aggs = []
    for h in range(head):                      # static unroll; head is small
        sl = slice(h * d_head, (h + 1) * d_head)
        qh = q_all[:, sl]                      # (tq, d_head)
        kh = k_all[:, sl]                      # (Sk, d_head)
        vh = v_all[:, sl]                      # (Sk, d_head)

        # s = q @ k^T, contracting the last dims (standard flash NT form), f32 acc.
        s = lax.dot_general(qh, kh, (((1,), (1,)), ((), ())),
                            preferred_element_type=jnp.float32)          # (tq, Sk)
        s = s - jnp.max(s, axis=-1, keepdims=True)
        e = jnp.exp(s)
        # Exact reciprocal: the normalized probabilities are a user-visible output,
        # and the reciprocal is only over (tq, 1) elements anyway.
        p = e * (1.0 / jnp.sum(e, axis=-1, keepdims=True))               # (tq, Sk) f32

        # Head-mean score accumulated straight into the output ref (no extra buffer).
        contrib = (p * inv_head).astype(score_ref.dtype)
        if h == 0:
            score_ref[0] = contrib
        else:
            score_ref[0] = score_ref[0] + contrib

        # P @ V with f32 accumulation; keep the per-head slab in bf16.
        aggs.append(jnp.dot(p.astype(jnp.bfloat16), vh,
                            preferred_element_type=jnp.float32).astype(jnp.bfloat16))

    # Single output projection with contraction depth K = h_dim (full MXU depth),
    # instead of head accumulations with K = d_head.
    agg = jnp.concatenate(aggs, axis=-1)                                  # (tq, h_dim) bf16
    out = jnp.dot(agg, wo_ref[...], preferred_element_type=jnp.float32) + bo_ref[...]
    out_ref[0] = out.astype(out_ref.dtype)


# ---------------------------------------------------------------------------
# Wrapper
# ---------------------------------------------------------------------------
def _pick_tile(n, cap=256):
    """Largest tile <= cap dividing n that is a multiple of 8 (or the full extent)."""
    if n <= cap:
        return n
    for t in range(cap, 7, -1):
        if n % t == 0 and t % 8 == 0:
            return t
    return n   # no aligned divisor; full extent is always a legal block dim


def multi_head_attention(query, key, value, params, *, head,
                         tq=None, score_dtype=jnp.float32,
                         vmem_limit_bytes=40 * 1024 * 1024):
    """query/key/value: (B, S, d_model) f32. Returns (out f32, attention_score)."""
    wq, bq, wk, bk, wv, bv, wo, bo = params
    B, Sq, d_model = query.shape
    Sk = key.shape[1]
    h_dim = wq.shape[1]
    out_dim = wo.shape[1]
    assert h_dim % head == 0
    d_head = h_dim // head
    scale = 1.0 / math.sqrt(d_head)

    # One-time wrapper-side constant transforms: fold softmax scale into the Q
    # projection; bf16 weights (MXU operands), f32 biases (added to f32 accumulators).
    wq_s = (wq * scale).astype(jnp.bfloat16)
    bq_s = (bq * scale).astype(jnp.float32)
    wk_b, bk_f = wk.astype(jnp.bfloat16), bk.astype(jnp.float32)
    wv_b, bv_f = wv.astype(jnp.bfloat16), bv.astype(jnp.float32)
    wo_b, bo_f = wo.astype(jnp.bfloat16), bo.astype(jnp.float32)

    # Projections as full-width matmuls over flattened (B*S) rows.
    qx = query.astype(jnp.bfloat16).reshape(B * Sq, d_model)
    kx = key.astype(jnp.bfloat16).reshape(B * Sk, d_model)
    vx = value.astype(jnp.bfloat16).reshape(B * Sk, d_model)
    tm_q = _pick_tile(B * Sq, 256)
    tm_k = _pick_tile(B * Sk, 256)
    q_proj = _linear(qx, wq_s, bq_s, tm=tm_q,
                     vmem_limit_bytes=vmem_limit_bytes).reshape(B, Sq, h_dim)
    k_proj = _linear(kx, wk_b, bk_f, tm=tm_k,
                     vmem_limit_bytes=vmem_limit_bytes).reshape(B, Sk, h_dim)
    v_proj = _linear(vx, wv_b, bv_f, tm=tm_k,
                     vmem_limit_bytes=vmem_limit_bytes).reshape(B, Sk, h_dim)

    # Query-tile size bounds per-step VMEM ((tq, Sk) temporaries + score block).
    if tq is None:
        tq = _pick_tile(Sq, 256)
    assert Sq % tq == 0, "Sq must be divisible by the query tile size"
    nq = Sq // tq

    kernel = functools.partial(_attention_kernel, head=head, d_head=d_head)

    out, score = pl.pallas_call(
        kernel,
        out_shape=(jax.ShapeDtypeStruct((B, Sq, out_dim), jnp.float32),
                   jax.ShapeDtypeStruct((B, Sq, Sk), score_dtype)),
        grid_spec=pltpu.PrefetchScalarGridSpec(
            num_scalar_prefetch=0,
            grid=(B, nq),
            in_specs=[
                pl.BlockSpec((1, tq, h_dim), lambda b, q: (b, q, 0)),   # projected Q tile
                pl.BlockSpec((1, Sk, h_dim), lambda b, q: (b, 0, 0)),   # projected K (per batch)
                pl.BlockSpec((1, Sk, h_dim), lambda b, q: (b, 0, 0)),   # projected V (per batch)
                pl.BlockSpec((h_dim, out_dim), lambda b, q: (0, 0)),    # W_out
                pl.BlockSpec((1, out_dim), lambda b, q: (0, 0)),        # b_out
            ],
            out_specs=[
                pl.BlockSpec((1, tq, out_dim), lambda b, q: (b, q, 0)),
                pl.BlockSpec((1, tq, Sk), lambda b, q: (b, q, 0)),
            ],
        ),
        compiler_params=pltpu.CompilerParams(
            # No cross-q-tile scratch carry -> both axes independent (megacore-friendly).
            dimension_semantics=("parallel", "parallel"),
            vmem_limit_bytes=vmem_limit_bytes),
    )(q_proj, k_proj, v_proj, wo_b, bo_f)
    return out, score


# ---------------------------------------------------------------------------
# Pure-JAX f32 reference (value_mask=None, mask=None, no dropout)
# ---------------------------------------------------------------------------
def reference(query, key, value, params, *, head):
    wq, bq, wk, bk, wv, bv, wo, bo = params
    B, Sq, _ = query.shape
    h_dim = wq.shape[1]
    d_head = h_dim // head
    q = (query @ wq + bq).reshape(B, Sq, head, d_head).transpose(0, 2, 1, 3)
    k = (key @ wk + bk).reshape(B, -1, head, d_head).transpose(0, 2, 1, 3)
    v = (value @ wv + bv).reshape(B, -1, head, d_head).transpose(0, 2, 1, 3)
    s = jnp.einsum("bhqd,bhkd->bhqk", q, k) / math.sqrt(d_head)
    p = jax.nn.softmax(s, axis=-1)
    score = jnp.mean(p, axis=1)
    agg = jnp.einsum("bhqk,bhkd->bhqd", p, v).transpose(0, 2, 1, 3).reshape(B, Sq, h_dim)
    return agg @ wo + bo, score


if __name__ == "__main__":
    B, S, d_model = 2, 8, 32
    head = 4
    h_dim = d_model
    out_dim = d_model

    key0 = jax.random.PRNGKey(0)
    ks = jax.random.split(key0, 11)
    query = jax.random.normal(ks[0], (B, S, d_model), jnp.float32)
    kx = jax.random.normal(ks[1], (B, S, d_model), jnp.float32)
    vx = jax.random.normal(ks[2], (B, S, d_model), jnp.float32)

    def init_linear(kw, kb, fan_in, fan_out):
        bound = 1.0 / math.sqrt(fan_in)
        w = jax.random.uniform(kw, (fan_in, fan_out), jnp.float32, -bound, bound)
        b = jax.random.uniform(kb, (1, fan_out), jnp.float32, -bound, bound)
        return w, b

    wq, bq = init_linear(ks[3], ks[4], d_model, h_dim)
    wk, bk = init_linear(ks[5], ks[6], d_model, h_dim)
    wv, bv = init_linear(ks[7], ks[8], d_model, h_dim)
    wo, bo = init_linear(ks[9], ks[10], h_dim, out_dim)
    params = (wq, bq, wk, bk, wv, bv, wo, bo)

    out, score = multi_head_attention(query, kx, vx, params, head=head)
    out, score = jax.block_until_ready((out, score))

    ref_out, ref_score = reference(query, kx, vx, params, head=head)
    # bf16 MXU operands inside the kernels -> tolerances loosened vs a pure-f32 reference.
    assert jnp.allclose(out, ref_out, atol=3e-2, rtol=3e-2), "output mismatch"
    assert jnp.allclose(score, ref_score, atol=2e-2, rtol=3e-2), "score mismatch"

    print("KERNEL_OK")
</pallas_src>

<mosaic_0001>
module attributes {stable_mosaic.version = 11 : i64} {
  func.func @_linear_kernel(%arg0: i32, %arg1: memref<16x32xbf16, #tpu.memory_space<vmem>>, %arg2: memref<32x32xbf16, #tpu.memory_space<vmem>>, %arg3: memref<1x32xf32, #tpu.memory_space<vmem>>, %arg4: memref<16x32xbf16, #tpu.memory_space<vmem>>) attributes {dimension_semantics = [#tpu.dimension_semantics<parallel>], iteration_bounds = array<i64: 1>, scalar_prefetch = 0 : i64, scratch_operands = 0 : i64, tpu.core_type = #tpu.core_type<tc>, window_params = [{transform_indices = @transform_0, window_bounds = array<i64: 16, 32>}, {pipeline_mode = #tpu.pipeline_mode<synchronous>, transform_indices = @transform_1, window_bounds = array<i64: 32, 32>}, {pipeline_mode = #tpu.pipeline_mode<synchronous>, transform_indices = @transform_2, window_bounds = array<i64: 1, 32>}, {transform_indices = @transform_3, window_bounds = array<i64: 16, 32>}]} {
    %c0 = arith.constant 0 : index
    %c0_0 = arith.constant 0 : index
    %0 = vector.load %arg1[%c0, %c0_0] : memref<16x32xbf16, #tpu.memory_space<vmem>>, vector<16x32xbf16>
    %c0_1 = arith.constant 0 : index
    %c0_2 = arith.constant 0 : index
    %1 = vector.load %arg2[%c0_1, %c0_2] : memref<32x32xbf16, #tpu.memory_space<vmem>>, vector<32x32xbf16>
    %cst = arith.constant dense<0.000000e+00> : vector<16x32xf32>
    %2 = tpu.matmul %0, %1, %cst {dimension_numbers = #tpu.dot_dimension_numbers<[1], [0], [0], [1], [0, 0, 1, 1], [], []>} : vector<16x32xbf16>, vector<32x32xbf16>, vector<16x32xf32> -> vector<16x32xf32>
    %c0_3 = arith.constant 0 : index
    %c0_4 = arith.constant 0 : index
    %3 = vector.load %arg3[%c0_3, %c0_4] : memref<1x32xf32, #tpu.memory_space<vmem>>, vector<1x32xf32>
    %4 = vector.broadcast %3 : vector<1x32xf32> to vector<16x32xf32>
    %5 = arith.addf %2, %4 : vector<16x32xf32>
    %6 = arith.truncf %5 : vector<16x32xf32> to vector<16x32xbf16>
    %c0_5 = arith.constant 0 : index
    %c0_6 = arith.constant 0 : index
    %7 = vector.load %arg4[%c0_5, %c0_6] : memref<16x32xbf16, #tpu.memory_space<vmem>>, vector<16x32xbf16>
    tpu.vector_store %arg4[%c0_5, %c0_6], %6 {strides = array<i32>} : memref<16x32xbf16, #tpu.memory_space<vmem>>, vector<16x32xbf16>,
    return
  }
  func.func @transform_0(%arg0: i32) -> (i32, i32) {
    %c0_i32 = arith.constant 0 : i32
    %c0_i32_0 = arith.constant 0 : i32
    return %arg0, %c0_i32 : i32, i32
  }
  func.func @transform_1(%arg0: i32) -> (i32, i32) {
    %c0_i32 = arith.constant 0 : i32
    %c0_i32_0 = arith.constant 0 : i32
    %c0_i32_1 = arith.constant 0 : i32
    return %c0_i32, %c0_i32_0 : i32, i32
  }
  func.func @transform_2(%arg0: i32) -> (i32, i32) {
    %c0_i32 = arith.constant 0 : i32
    %c0_i32_0 = arith.constant 0 : i32
    %c0_i32_1 = arith.constant 0 : i32
    return %c0_i32, %c0_i32_0 : i32, i32
  }
  func.func @transform_3(%arg0: i32) -> (i32, i32) {
    %c0_i32 = arith.constant 0 : i32
    %c0_i32_0 = arith.constant 0 : i32
    return %arg0, %c0_i32 : i32, i32
  }
}

</mosaic_0001>

<bundles_post_ra>
// kernel: tpu_custom_call.1
= control target key start
LH: loop header
LB: loop body
LE: loop exit
PB: predicated region body
PF: predicated region fallthrough
CT: control target
= control target key end

     0   :  { %8 = vsyncpa [#allocation3], 0  ;;  %s292_s0 = inlined_call_operand.hbm [shape: bf16[16,32], index: 0, kind: input, shape index: {}]   ;;  %s293_s1 = inlined_call_operand.hbm [shape: bf16[32,32], index: 1, kind: input, shape index: {}]   ;;  %s294_s2 = inlined_call_operand.vmem [shape: f32[1,32], index: 2, kind: input, shape index: {}]   ;;  %s295_s3 = inlined_call_operand.hbm [shape: bf16[16,32], index: 3, kind: output, shape index: {}]  }
   0x1   :  { %9 = vsyncpa [#allocation6], 0 }
   0x2   :  { %10 = vsyncpa [#allocation4], 0  ;;  %s244_s12 = smov [#allocation2]  }
   0x3   :  { %s16_s13 = sshll.u32 %s244_s12, 4  ;;  %s17_s13 = int_to_ptr.vmem [resolvable:$true] %s16_s13 }
   0x4   :  { %s186_s14 = scalar_lea.vmem %s17_s13, 128  ;;  %p191_p1 = scmp.lt.s32.totalorder %s17_s13, %s17_s13 }
   0x5   :  { %p187_p0 = scmp.ne.s32.totalorder %s17_s13, %s186_s14  ;;  %p192_p2 = scmp.lt.s32.totalorder %s186_s14, %s186_s14 }
   0x7   :  { %p193_p3 = por %p192_p2, %p191_p1 }
   0x9   :  { %p194_p4 = pnand %p193_p3, %p187_p0 }
   0xb   :  { %197 = shalt.err (!%p194_p4)
}
   0xc   :  { %s245_s15 = smov 64   ;;  %s246_s16 = smov 4  }
   0xd   :  { %22 = dma.hbm_to_vmem [thread:$0]  %s292_s0, 128, %s17_s13, [#allocation3], %s245_s15, %s245_s15, %s246_s16  }
   0xe   :  { %s247_s19 = smov [#allocation5]  }
   0xf   :  { %s28_s20 = sshll.u32 %s247_s19, 4  ;;  %s29_s20 = int_to_ptr.vmem [resolvable:$true] %s28_s20 }
  0x10   :  { %s206_s21 = scalar_lea.vmem %s29_s20, 256  ;;  %p211_p6 = scmp.lt.s32.totalorder %s29_s20, %s29_s20 }
  0x11   :  { %p207_p5 = scmp.ne.s32.totalorder %s29_s20, %s206_s21  ;;  %p212_p7 = scmp.lt.s32.totalorder %s206_s21, %s206_s21 }
  0x13   :  { %p213_p8 = por %p212_p7, %p211_p6 }
  0x15   :  { %p214_p9 = pnand %p213_p8, %p207_p5 }
  0x17   :  { %217 = shalt.err (!%p214_p9)
}
  0x18   :  { %34 = dma.hbm_to_vmem [thread:$0]  %s293_s1, 256, %s29_s20, [#allocation6], %s245_s15, %s245_s15, %s246_s16  }
  0x19   :  { %238 = dma.done.wait [#allocation3], 128  }
  0x1a   :  { %239 = vsyncadd [#allocation3], 4294967168 }
  0x1b   :  { %240 = dma.done.wait [#allocation6], 256  }
  0x1c   :  { %241 = vsyncadd [#allocation6], 4294967040  ;;  %v248_v0 = vmov 0.0   ;;  %vm249_vm0 = vmmov 0   ;;  %v175_v1 = vld [vmem:[#allocation5 + $0x8] sm:$0xff]   ;;  %v176_v2 = vld [vmem:[#allocation5] sm:$0xff]  }
  0x1d   :  { %160 = vmatprep.subr.bf16.mxu0 %v248_v0  ;;  %164 = vmatprep.mubr.msk.bf16.mxu0 %vm249_vm0, %v248_v0  ;;  %v177_v3 = vld [vmem:[#allocation2] sm:$0xff]   ;;  %vm74_vm1 = vcmask 261120   ;;  %vm127_vm2 = vcmask 257024   ;;  %s250_s1 = smov [#allocation7]  }
  0x1e   :  { %161 = vmatpush3.bf16.msra.mxu0 %v175_v1  ;;  %v148_v4 = vld [vmem:[%s294_s2] ss:$0 sm:$0xff]  ;;  %s135_s25 = sshll.u32 %s250_s1, 4  ;;  %s136_s25 = int_to_ptr.vmem [resolvable:$true] %s135_s25 }
  0x1f   :  { %162 = vmatprep.subr.bf16.mxu0 %v248_v0  ;;  %s218_s26 = scalar_lea.vmem %s136_s25, 128  ;;  %p223_p11 = scmp.lt.s32.totalorder %s136_s25, %s136_s25 }
  0x20   :  { %p219_p10 = scmp.ne.s32.totalorder %s136_s25, %s218_s26  ;;  %p224_p12 = scmp.lt.s32.totalorder %s218_s26, %s218_s26 }
  0x22   :  { %163 = vmatpush3.bf16.msra.mxu0 %v176_v2  ;;  %p225_p13 = por %p224_p12, %p223_p11 }
  0x24   :  { %p226_p0 = pnand %p225_p13, %p219_p10 }
  0x25   :  { %165 = vmatmul.mubr.msk.bf16.vlgmr.msra.gmra.mxu0 %vm74_vm1, %v177_v3 }
  0xe5   :  { %v112_v5 = vpop.f32.mrf.mxu0 }
  0xe6   :  { %v113_v6 = vadd.f32 %v148_v4, %v112_v5 }
  0xe7   :  { %v166_v7 = vpop.f32.mrf.mxu0 }
  0xe8   :  { %v155_v8 = vpack.c.bf16 %v113_v6, %v113_v6 }
  0xe9   :  { %v115_v9 = vpop.f32.mrf.mxu0 }
  0xea   :  { %v116_v10 = vadd.f32 %v148_v4, %v115_v9  ;;  %128 = vst.msk [vmem:[#allocation7] sm:$0xf] %vm127_vm2, %v155_v8 }
  0xeb   :  { %v167_v11 = vpop.f32.mrf.mxu0 }
  0xec   :  { %v156_v12 = vpack.c.bf16 %v116_v10, %v116_v10 }
  0xee   :  { %129 = vst.msk [vmem:[#allocation7 + $0x4] sm:$0xf] %vm127_vm2, %v156_v12 }
  0xef   :  { %229 = shalt.err (!%p226_p0)
}
  0xf0   :  { %141 = dma.vmem_to_hbm [thread:$0]  %s136_s25, 128, %s295_s3, [#allocation4], %s245_s15, %s245_s15, %s246_s16  }
  0xf1   :  { %242 = dma.done.wait [#allocation4], 128  }
  0xf2   :  { %243 = vsyncadd [#allocation4], 4294967168 }
  0xf3   :  { %145 = vsyncpa [#allocation3], 1 }
  0xf4   :  { %146 = vsyncpa [#allocation6], 1 }
  0xf5   :  { %147 = vsyncpa [#allocation4], 1 }

</bundles_post_ra>
